<compile_context>
chip_gen: v6e
topology: v6e:2x2x1
jax: 0.10.0
libtpu: 0.0.40
codegen_flags: <defaults>
</compile_context>

<pallas_src>
import jax
import jax.numpy as jnp
from jax.experimental import pallas as pl
from jax.experimental.pallas import tpu as pltpu

LANE = 128
SUBLANE = 8


def _round_up(x, m):
    return (x + m - 1) // m * m


def _leaky_relu(x, negative_slope=0.01):
    # PyTorch nn.LeakyReLU() default negative_slope = 0.01
    return jnp.where(x >= 0, x, negative_slope * x)


def dqn_dueling_kernel(x_ref, w1_ref, w2_ref, wq_ref, bias_ref, out_ref):
    # Static (trace-time) padded dims from the ref shapes.
    h_pad = w1_ref.shape[1]
    o_pad = wq_ref.shape[1]

    # Single fused bias buffer: row 0 = b1, row 1 = b2, row 2 = folded head bias.
    biases = bias_ref[...]                      # (8, bias_w) f32
    b1 = biases[0:1, :h_pad]
    b2 = biases[1:2, :h_pad]
    bq = biases[2:3, :o_pad]

    # Hidden MLP: bf16 operands, f32 accumulation on the MXU, f32 bias/activations.
    x = x_ref[...].astype(jnp.bfloat16)         # (b_tile, state_size), K is small
    h1 = jnp.dot(x, w1_ref[...], preferred_element_type=jnp.float32) + b1
    h1 = _leaky_relu(h1).astype(jnp.bfloat16)

    h2 = jnp.dot(h1, w2_ref[...], preferred_element_type=jnp.float32) + b2
    h2 = _leaky_relu(h2).astype(jnp.bfloat16)

    # Folded dueling head: columns [0, A) already hold V + (A - mean(A));
    # remaining lanes are zero padding, sliced off by the wrapper.
    q = jnp.dot(h2, wq_ref[...], preferred_element_type=jnp.float32) + bq
    out_ref[...] = q.astype(out_ref.dtype)


def init_params(key, state_size, action_size, hidden_features=64):
    """f32 parameters matching the PyTorch module (W stored transposed: [in, out])."""
    ks = jax.random.split(key, 8)

    def lin(kw, kb, fan_in, fan_out):
        bound = 1.0 / jnp.sqrt(jnp.float32(fan_in))
        w = jax.random.uniform(kw, (fan_in, fan_out), jnp.float32, -bound, bound)
        b = jax.random.uniform(kb, (1, fan_out), jnp.float32, -bound, bound)
        return w, b

    w1, b1 = lin(ks[0], ks[1], state_size, hidden_features)
    w2, b2 = lin(ks[2], ks[3], hidden_features, hidden_features)
    wv, bv = lin(ks[4], ks[5], hidden_features, 1)
    wa, ba = lin(ks[6], ks[7], hidden_features, action_size)
    return {"w1": w1, "b1": b1, "w2": w2, "b2": b2,
            "wv": wv, "bv": bv, "wa": wa, "ba": ba}


def pack_params(params, state_size, action_size, hidden_features):
    """Pad hidden/head dims to 128 multiples, fold the dueling combine into the
    head (in f32), fuse the three biases into one (8, 128) buffer, and cast the
    matmul weights to bf16. The state (input) dim is NOT padded."""
    h_pad = _round_up(hidden_features, LANE)
    o_pad = _round_up(action_size, LANE)
    bias_w = max(h_pad, o_pad)

    def pad2(a, rows, cols):
        return jnp.pad(a, ((0, rows - a.shape[0]), (0, cols - a.shape[1])))

    # Fold the dueling combine (done in f32, before the bf16 cast):
    #   Q_j(x) = A_j(x) + V(x) - mean_k A_k(x)
    wq = params["wa"] + params["wv"] - params["wa"].mean(axis=1, keepdims=True)
    bq = params["ba"] + params["bv"] - params["ba"].mean(axis=1, keepdims=True)

    bias = jnp.zeros((SUBLANE, bias_w), jnp.float32)
    bias = bias.at[0, :h_pad].set(pad2(params["b1"], 1, h_pad)[0])
    bias = bias.at[1, :h_pad].set(pad2(params["b2"], 1, h_pad)[0])
    bias = bias.at[2, :o_pad].set(pad2(bq, 1, o_pad)[0])

    return {
        "w1": pad2(params["w1"], state_size, h_pad).astype(jnp.bfloat16),
        "w2": pad2(params["w2"], h_pad, h_pad).astype(jnp.bfloat16),
        "wq": pad2(wq, h_pad, o_pad).astype(jnp.bfloat16),
        "bias": bias,
    }


def dqn_forward(x, packed, action_size, *, max_batch_tile=1024,
                out_dtype=jnp.bfloat16):
    """x: [B, state_size] float32; packed: output of pack_params."""
    B, state_size = x.shape
    assert packed["w1"].shape[0] == state_size
    h_pad = packed["w1"].shape[1]
    o_pad = packed["wq"].shape[1]
    bias_w = packed["bias"].shape[1]

    # Batch tiling:
    #  * tiny batches: one 16-row-rounded block (bf16 packs 16 rows / vreg).
    #  * mid batches (<= max tile): split into >= 2 grid steps so the
    #    "parallel" axis can shard across both v7x TensorCores.
    #  * large batches: 1024-row tiles (~1-2 MiB VMEM incl. double buffering,
    #    well under every generation's budget).
    b_small = _round_up(B, 16)
    if b_small <= LANE:
        b_tile = b_small
    elif b_small <= max_batch_tile:
        b_tile = _round_up((b_small + 1) // 2, LANE)
    else:
        b_tile = max_batch_tile
    b_padded = _round_up(B, b_tile)

    # Only batch rows are padded; the feature dim stays at its true size and is
    # cast to bf16 inside the kernel (no wrapper-side pad/cast of the lanes).
    xp = x if b_padded == B else jnp.pad(x, ((0, b_padded - B), (0, 0)))

    out_bytes = jnp.dtype(out_dtype).itemsize
    flops = 2 * b_padded * (state_size * h_pad + h_pad * h_pad + h_pad * o_pad)
    bytes_accessed = (
        b_padded * state_size * 4                 # x (f32, true feature dim)
        + state_size * h_pad * 2                  # w1 (bf16)
        + h_pad * h_pad * 2                       # w2 (bf16)
        + h_pad * o_pad * 2                       # folded head (bf16)
        + SUBLANE * bias_w * 4                    # fused biases (f32)
        + b_padded * o_pad * out_bytes            # padded output
    )

    out_padded = pl.pallas_call(
        dqn_dueling_kernel,
        out_shape=jax.ShapeDtypeStruct((b_padded, o_pad), out_dtype),
        grid_spec=pltpu.PrefetchScalarGridSpec(
            num_scalar_prefetch=0,
            grid=(b_padded // b_tile,),
            in_specs=[
                pl.BlockSpec((b_tile, state_size), lambda i: (i, 0)),  # x
                pl.BlockSpec((state_size, h_pad), lambda i: (0, 0)),   # w1
                pl.BlockSpec((h_pad, h_pad), lambda i: (0, 0)),        # w2
                pl.BlockSpec((h_pad, o_pad), lambda i: (0, 0)),        # folded head
                pl.BlockSpec((SUBLANE, bias_w), lambda i: (0, 0)),     # fused biases
            ],
            out_specs=pl.BlockSpec((b_tile, o_pad), lambda i: (i, 0)),
        ),
        compiler_params=pltpu.CompilerParams(
            dimension_semantics=("parallel",)),
        cost_estimate=pl.CostEstimate(
            flops=flops, transcendentals=0, bytes_accessed=bytes_accessed),
    )(xp, packed["w1"], packed["w2"], packed["wq"], packed["bias"])

    # Strip batch padding and padded head lanes: Q-values live in cols [0, A).
    return out_padded[:B, :action_size]


def dqn_forward_ref(x, params):
    """Pure-JAX f32 reference matching the PyTorch module forward."""
    h = _leaky_relu(x @ params["w1"] + params["b1"])
    h = _leaky_relu(h @ params["w2"] + params["b2"])
    v = h @ params["wv"] + params["bv"]
    a = h @ params["wa"] + params["ba"]
    return v + (a - a.mean(axis=1, keepdims=True))


if __name__ == "__main__":
    # Small shapes consistent with the module's forward (vector state input).
    batch = 2
    state_size = 16
    action_size = 4
    hidden_features = 32

    key = jax.random.PRNGKey(0)
    k_x, k_p = jax.random.split(key)

    x = jax.random.normal(k_x, (batch, state_size), dtype=jnp.float32)
    params = init_params(k_p, state_size, action_size, hidden_features)
    packed = pack_params(params, state_size, action_size, hidden_features)

    out = dqn_forward(x, packed, action_size)
    out = jax.block_until_ready(out)

    ref = dqn_forward_ref(x, params)
    assert out.shape == (batch, action_size)
    # bf16 matmul operands / bf16 output (f32 accumulation) -> loosened
    # tolerance vs the f32 reference.
    assert jnp.allclose(out.astype(jnp.float32), ref, atol=3e-2, rtol=3e-2)

    print("KERNEL_OK")
</pallas_src>

<mosaic_0001>
module attributes {stable_mosaic.version = 11 : i64} {
  func.func @dqn_dueling_kernel(%arg0: i32, %arg1: memref<16x16xf32, #tpu.memory_space<vmem>>, %arg2: memref<16x128xbf16, #tpu.memory_space<vmem>>, %arg3: memref<128x128xbf16, #tpu.memory_space<vmem>>, %arg4: memref<128x128xbf16, #tpu.memory_space<vmem>>, %arg5: memref<8x128xf32, #tpu.memory_space<vmem>>, %arg6: memref<16x128xbf16, #tpu.memory_space<vmem>>) attributes {dimension_semantics = [#tpu.dimension_semantics<parallel>], iteration_bounds = array<i64: 1>, scalar_prefetch = 0 : i64, scratch_operands = 0 : i64, tpu.core_type = #tpu.core_type<tc>, window_params = [{transform_indices = @transform_0, window_bounds = array<i64: 16, 16>}, {pipeline_mode = #tpu.pipeline_mode<synchronous>, transform_indices = @transform_1, window_bounds = array<i64: 16, 128>}, {pipeline_mode = #tpu.pipeline_mode<synchronous>, transform_indices = @transform_2, window_bounds = array<i64: 128, 128>}, {pipeline_mode = #tpu.pipeline_mode<synchronous>, transform_indices = @transform_3, window_bounds = array<i64: 128, 128>}, {pipeline_mode = #tpu.pipeline_mode<synchronous>, transform_indices = @transform_4, window_bounds = array<i64: 8, 128>}, {transform_indices = @transform_5, window_bounds = array<i64: 16, 128>}]} {
    %c0 = arith.constant 0 : index
    %c0_0 = arith.constant 0 : index
    %0 = vector.load %arg5[%c0, %c0_0] : memref<8x128xf32, #tpu.memory_space<vmem>>, vector<8x128xf32>
    %1 = vector.extract_strided_slice %0 {offsets = [0, 0], sizes = [1, 128], strides = [1, 1]} : vector<8x128xf32> to vector<1x128xf32>
    %2 = vector.extract_strided_slice %0 {offsets = [1, 0], sizes = [1, 128], strides = [1, 1]} : vector<8x128xf32> to vector<1x128xf32>
    %3 = vector.extract_strided_slice %0 {offsets = [2, 0], sizes = [1, 128], strides = [1, 1]} : vector<8x128xf32> to vector<1x128xf32>
    %c0_1 = arith.constant 0 : index
    %c0_2 = arith.constant 0 : index
    %4 = vector.load %arg1[%c0_1, %c0_2] : memref<16x16xf32, #tpu.memory_space<vmem>>, vector<16x16xf32>
    %5 = arith.truncf %4 : vector<16x16xf32> to vector<16x16xbf16>
    %c0_3 = arith.constant 0 : index
    %c0_4 = arith.constant 0 : index
    %6 = vector.load %arg2[%c0_3, %c0_4] : memref<16x128xbf16, #tpu.memory_space<vmem>>, vector<16x128xbf16>
    %cst = arith.constant dense<0.000000e+00> : vector<16x128xf32>
    %7 = tpu.matmul %5, %6, %cst {dimension_numbers = #tpu.dot_dimension_numbers<[1], [0], [0], [1], [0, 0, 1, 1], [], []>} : vector<16x16xbf16>, vector<16x128xbf16>, vector<16x128xf32> -> vector<16x128xf32>
    %8 = vector.broadcast %1 : vector<1x128xf32> to vector<16x128xf32>
    %9 = arith.addf %7, %8 : vector<16x128xf32>
    %cst_5 = arith.constant 0.000000e+00 : f32
    %10 = vector.broadcast %cst_5 : f32 to vector<16x128xf32>
    %11 = arith.cmpf oge, %9, %10 : vector<16x128xf32>
    %cst_6 = arith.constant 0.00999999977 : f32
    %12 = vector.broadcast %cst_6 : f32 to vector<16x128xf32>
    %13 = arith.mulf %12, %9 : vector<16x128xf32>
    %14 = arith.select %11, %9, %13 : vector<16x128xi1>, vector<16x128xf32>
    %15 = arith.truncf %14 : vector<16x128xf32> to vector<16x128xbf16>
    %c0_7 = arith.constant 0 : index
    %c0_8 = arith.constant 0 : index
    %16 = vector.load %arg3[%c0_7, %c0_8] : memref<128x128xbf16, #tpu.memory_space<vmem>>, vector<128x128xbf16>
    %cst_9 = arith.constant dense<0.000000e+00> : vector<16x128xf32>
    %17 = tpu.matmul %15, %16, %cst_9 {dimension_numbers = #tpu.dot_dimension_numbers<[1], [0], [0], [1], [0, 0, 1, 1], [], []>} : vector<16x128xbf16>, vector<128x128xbf16>, vector<16x128xf32> -> vector<16x128xf32>
    %18 = vector.broadcast %2 : vector<1x128xf32> to vector<16x128xf32>
    %19 = arith.addf %17, %18 : vector<16x128xf32>
    %cst_10 = arith.constant 0.000000e+00 : f32
    %20 = vector.broadcast %cst_10 : f32 to vector<16x128xf32>
    %21 = arith.cmpf oge, %19, %20 : vector<16x128xf32>
    %cst_11 = arith.constant 0.00999999977 : f32
    %22 = vector.broadcast %cst_11 : f32 to vector<16x128xf32>
    %23 = arith.mulf %22, %19 : vector<16x128xf32>
    %24 = arith.select %21, %19, %23 : vector<16x128xi1>, vector<16x128xf32>
    %25 = arith.truncf %24 : vector<16x128xf32> to vector<16x128xbf16>
    %c0_12 = arith.constant 0 : index
    %c0_13 = arith.constant 0 : index
    %26 = vector.load %arg4[%c0_12, %c0_13] : memref<128x128xbf16, #tpu.memory_space<vmem>>, vector<128x128xbf16>
    %cst_14 = arith.constant dense<0.000000e+00> : vector<16x128xf32>
    %27 = tpu.matmul %25, %26, %cst_14 {dimension_numbers = #tpu.dot_dimension_numbers<[1], [0], [0], [1], [0, 0, 1, 1], [], []>} : vector<16x128xbf16>, vector<128x128xbf16>, vector<16x128xf32> -> vector<16x128xf32>
    %28 = vector.broadcast %3 : vector<1x128xf32> to vector<16x128xf32>
    %29 = arith.addf %27, %28 : vector<16x128xf32>
    %30 = arith.truncf %29 : vector<16x128xf32> to vector<16x128xbf16>
    %c0_15 = arith.constant 0 : index
    %c0_16 = arith.constant 0 : index
    %31 = vector.load %arg6[%c0_15, %c0_16] : memref<16x128xbf16, #tpu.memory_space<vmem>>, vector<16x128xbf16>
    tpu.vector_store %arg6[%c0_15, %c0_16], %30 {strides = array<i32>} : memref<16x128xbf16, #tpu.memory_space<vmem>>, vector<16x128xbf16>,
    return
  }
  func.func @transform_0(%arg0: i32) -> (i32, i32) {
    %c0_i32 = arith.constant 0 : i32
    %c0_i32_0 = arith.constant 0 : i32
    return %arg0, %c0_i32 : i32, i32
  }
  func.func @transform_1(%arg0: i32) -> (i32, i32) {
    %c0_i32 = arith.constant 0 : i32
    %c0_i32_0 = arith.constant 0 : i32
    %c0_i32_1 = arith.constant 0 : i32
    return %c0_i32, %c0_i32_0 : i32, i32
  }
  func.func @transform_2(%arg0: i32) -> (i32, i32) {
    %c0_i32 = arith.constant 0 : i32
    %c0_i32_0 = arith.constant 0 : i32
    %c0_i32_1 = arith.constant 0 : i32
    return %c0_i32, %c0_i32_0 : i32, i32
  }
  func.func @transform_3(%arg0: i32) -> (i32, i32) {
    %c0_i32 = arith.constant 0 : i32
    %c0_i32_0 = arith.constant 0 : i32
    %c0_i32_1 = arith.constant 0 : i32
    return %c0_i32, %c0_i32_0 : i32, i32
  }
  func.func @transform_4(%arg0: i32) -> (i32, i32) {
    %c0_i32 = arith.constant 0 : i32
    %c0_i32_0 = arith.constant 0 : i32
    %c0_i32_1 = arith.constant 0 : i32
    return %c0_i32, %c0_i32_0 : i32, i32
  }
  func.func @transform_5(%arg0: i32) -> (i32, i32) {
    %c0_i32 = arith.constant 0 : i32
    %c0_i32_0 = arith.constant 0 : i32
    return %arg0, %c0_i32 : i32, i32
  }
}

</mosaic_0001>

<bundles_post_ra>
// kernel: tpu_custom_call.1
= control target key start
LH: loop header
LB: loop body
LE: loop exit
PB: predicated region body
PF: predicated region fallthrough
CT: control target
= control target key end

     0   :  { %10 = vsyncpa [#allocation3], 0  ;;  %s755_s0 = inlined_call_operand.hbm [shape: f32[16,16], index: 0, kind: input, shape index: {}]   ;;  %s756_s1 = inlined_call_operand.hbm [shape: bf16[16,128], index: 1, kind: input, shape index: {}]   ;;  %s757_s2 = inlined_call_operand.hbm [shape: bf16[128,128], index: 2, kind: input, shape index: {}]   ;;  %s758_s3 = inlined_call_operand.hbm [shape: bf16[128,128], index: 3, kind: input, shape index: {}]   ;;  %s759_s4 = inlined_call_operand.hbm [shape: f32[8,128], index: 4, kind: input, shape index: {}]   ;;  %s760_s5 = inlined_call_operand.hbm [shape: bf16[16,128], index: 5, kind: output, shape index: {}]  }
   0x1   :  { %11 = vsyncpa [#allocation6], 0 }
   0x2   :  { %12 = vsyncpa [#allocation9], 0 }
   0x3   :  { %13 = vsyncpa [#allocation4], 0  ;;  %s660_s18 = smov [#allocation5]  }
   0x4   :  { %s31_s19 = sshll.u32 %s660_s18, 4  ;;  %s32_s19 = int_to_ptr.vmem [resolvable:$true] %s31_s19 }
   0x5   :  { %s540_s20 = scalar_lea.vmem %s32_s19, 128  ;;  %p545_p1 = scmp.lt.s32.totalorder %s32_s19, %s32_s19 }
   0x6   :  { %p541_p0 = scmp.ne.s32.totalorder %s32_s19, %s540_s20  ;;  %p546_p2 = scmp.lt.s32.totalorder %s540_s20, %s540_s20 }
   0x8   :  { %p547_p3 = por %p546_p2, %p545_p1 }
   0xa   :  { %p548_p4 = pnand %p547_p3, %p541_p0 }
   0xc   :  { %551 = shalt.err (!%p548_p4)
}
   0xd   :  { %s661_s21 = smov 64   ;;  %s662_s22 = smov 4  }
   0xe   :  { %37 = dma.hbm_to_vmem [thread:$0]  %s756_s1, 128, %s32_s19, [#allocation6], %s661_s21, %s661_s21, %s662_s22  }
   0xf   :  { %s663_s25 = smov [#allocation8]   ;;  %s664_s27 = smov [#allocation2]  }
  0x10   :  { %s55_s26 = sshll.u32 %s663_s25, 4  ;;  %s19_s28 = sshll.u32 %s664_s27, 4  ;;  %s56_s26 = int_to_ptr.vmem [resolvable:$true] %s55_s26  ;;  %s20_s28 = int_to_ptr.vmem [resolvable:$true] %s19_s28 }
  0x11   :  { %s560_s29 = scalar_lea.vmem %s56_s26, 1024  ;;  %p565_p6 = scmp.lt.s32.totalorder %s56_s26, %s56_s26 }
  0x12   :  { %p561_p5 = scmp.ne.s32.totalorder %s56_s26, %s560_s29  ;;  %p566_p7 = scmp.lt.s32.totalorder %s560_s29, %s560_s29 }
  0x14   :  { %p567_p8 = por %p566_p7, %p565_p6 }
  0x16   :  { %p568_p9 = pnand %p567_p8, %p561_p5 }
  0x18   :  { %571 = shalt.err (!%p568_p9)
}
  0x19   :  { %61 = dma.hbm_to_vmem [thread:$0]  %s758_s3, 1024, %s56_s26, [#allocation9], %s661_s21, %s661_s21, %s662_s22  }
  0x1a   :  { %s580_s1 = scalar_lea.vmem %s20_s28, 256  ;;  %p585_p11 = scmp.lt.s32.totalorder %s20_s28, %s20_s28 }
  0x1b   :  { %p581_p10 = scmp.ne.s32.totalorder %s20_s28, %s580_s1  ;;  %p586_p12 = scmp.lt.s32.totalorder %s580_s1, %s580_s1 }
  0x1d   :  { %p587_p13 = por %p586_p12, %p585_p11 }
  0x1f   :  { %p588_p0 = pnand %p587_p13, %p581_p10 }
  0x21   :  { %591 = shalt.err (!%p588_p0)
}
  0x22   :  { %s665_s7 = smov 128   ;;  %s666_s8 = smov 8  }
  0x23   :  { %25 = dma.hbm_to_vmem [thread:$0]  %s755_s0, 256, %s20_s28, [#allocation3], %s665_s7, %s665_s7, %s666_s8  }
  0x24   :  { %s667_s11 = smov [#allocation7]   ;;  %s668_s13 = smov [#allocation10]  }
  0x25   :  { %s43_s12 = sshll.u32 %s667_s11, 4  ;;  %s68_s14 = sshll.u32 %s668_s13, 4  ;;  %s44_s12 = int_to_ptr.vmem [resolvable:$true] %s43_s12  ;;  %s69_s14 = int_to_ptr.vmem [resolvable:$true] %s68_s14 }
  0x26   :  { %s600_s3 = scalar_lea.vmem %s44_s12, 1024  ;;  %p605_p2 = scmp.lt.s32.totalorder %s44_s12, %s44_s12 }
  0x27   :  { %p601_p1 = scmp.ne.s32.totalorder %s44_s12, %s600_s3  ;;  %p606_p3 = scmp.lt.s32.totalorder %s600_s3, %s600_s3 }
  0x29   :  { %p607_p4 = por %p606_p3, %p605_p2 }
  0x2b   :  { %p608_p5 = pnand %p607_p4, %p601_p1 }
  0x2d   :  { %611 = shalt.err (!%p608_p5)
}
  0x2e   :  { %49 = dma.hbm_to_vmem [thread:$0]  %s757_s2, 1024, %s44_s12, [#allocation6], %s661_s21, %s661_s21, %s662_s22  }
  0x2f   :  { %s620_s0 = scalar_lea.vmem %s69_s14, 128  ;;  %p625_p7 = scmp.lt.s32.totalorder %s69_s14, %s69_s14 }
  0x30   :  { %p621_p6 = scmp.ne.s32.totalorder %s69_s14, %s620_s0  ;;  %p626_p8 = scmp.lt.s32.totalorder %s620_s0, %s620_s0 }
  0x32   :  { %p627_p9 = por %p626_p8, %p625_p7 }
  0x34   :  { %p628_p10 = pnand %p627_p9, %p621_p6 }
  0x36   :  { %631 = shalt.err (!%p628_p10)
}
  0x37   :  { %71 = dma.hbm_to_vmem [thread:$0]  %s759_s4, 128, %s69_s14, [#allocation9]  }
  0x38   :  { %652 = dma.done.wait [#allocation3], 256  }
  0x39   :  { %653 = vsyncadd [#allocation3], 4294967040 }
  0x3a   :  { %654 = dma.done.wait [#allocation6], 1152  }
  0x3b   :  { %655 = vsyncadd [#allocation6], 4294966144 }
  0x3c   :  { %656 = dma.done.wait [#allocation9], 1152  }
  0x3d   :  { %657 = vsyncadd [#allocation9], 4294966144  ;;  %v669_v0 = vmov 0.0   ;;  %vm670_vm0 = vmmov 0   ;;  %v515_v1 = vld [vmem:[#allocation5] sm:$0xff]   ;;  %v89_v2 = vld [vmem:[#allocation2] sm:$0xff]  ;;  %v94_v18 = vlaneseq }
  0x3e   :  { %457 = vmatprep.subr.bf16.mxu0 %v669_v0  ;;  %459 = vmatprep.mubr.msk.bf16.mxu0 %vm670_vm0, %v669_v0  ;;  %v90_v3 = vld [vmem:[#allocation2 + $0x8] sm:$0xff]  ;;  %vm104_vm1 = vcmask 130048   ;;  %v516_v5 = vld [vmem:[#allocation7 + $0x38] sm:$0xff]   ;;  %v518_v7 = vld [vmem:[#allocation7 + $0x28] sm:$0xff]   ;;  %s671_s2 = smov [#allocation11]  }
  0x3f   :  { %463 = vmatprep.subr.bf16.mxu1 %v669_v0  ;;  %479 = vmatprep.mubr.msk.bf16.mxu1 %vm670_vm0, %v669_v0  ;;  %v91_v4 = vpack.c.bf16 %v90_v3, %v89_v2  ;;  %v517_v6 = vld [vmem:[#allocation7 + $0x30] sm:$0xff]   ;;  %v519_v8 = vld [vmem:[#allocation7 + $0x20] sm:$0xff]   ;;  %v520_v9 = vld [vmem:[#allocation7 + $0x18] sm:$0xff]   ;;  %v95_v19 = vshrl.u32 %v94_v18, 7  ;;  %s396_s4 = sshll.u32 %s671_s2, 4  ;;  %s397_s4 = int_to_ptr.vmem [resolvable:$true] %s396_s4 }
  0x40   :  { %458 = vmatpush3.bf16.msra.mxu0 %v515_v1  ;;  %464 = vmatpush3.bf16.msra.mxu1 %v516_v5  ;;  %v521_v10 = vld [vmem:[#allocation7 + $0x10] sm:$0xff]   ;;  %v522_v11 = vld [vmem:[#allocation7 + $0x8] sm:$0xff]   ;;  %v523_v12 = vld [vmem:[#allocation7] sm:$0xff]   ;;  %s632_s19 = scalar_lea.vmem %s397_s4, 128  ;;  %p637_p12 = scmp.lt.s32.totalorder %s397_s4, %s397_s4 }
  0x41   :  { %483 = vmatprep.subr.bf16.mxu0 %v669_v0  ;;  %465 = vmatprep.subr.bf16.mxu1 %v669_v0  ;;  %v524_v13 = vld [vmem:[#allocation8 + $0x38] sm:$0xff]   ;;  %v525_v14 = vld [vmem:[#allocation8 + $0x30] sm:$0xff]   ;;  %v526_v15 = vld [vmem:[#allocation8 + $0x28] sm:$0xff]   ;;  %v96_v20 = vsub.s32 0, %v95_v19  ;;  %v174_v37 = vsub.s32 1, %v95_v19  ;;  %v290_v50 = vsub.s32 2, %v95_v19  ;;  %p633_p11 = scmp.ne.s32.totalorder %s397_s4, %s632_s19  ;;  %p638_p13 = scmp.lt.s32.totalorder %s632_s19, %s632_s19 }
  0x42   :  { %v527_v16 = vld [vmem:[#allocation8 + $0x20] sm:$0xff]   ;;  %v528_v17 = vld [vmem:[#allocation8 + $0x18] sm:$0xff]   ;;  %v529_v34 = vld [vmem:[#allocation8 + $0x10] sm:$0xff]  }
  0x43   :  { %460 = vmatmul.mubr.msk.bf16.vlgmr.msra.gmra.mxu0 %vm104_vm1, %v91_v4  ;;  %v88_v21 = vld [vmem:[#allocation10] sm:$0xff]  ;;  %v530_v35 = vld [vmem:[#allocation8 + $0x8] sm:$0xff]   ;;  %p639_p0 = por %p638_p13, %p637_p12 }
  0x44   :  { %499 = vmatprep.mubr.msk.bf16.mxu0 %vm670_vm0, %v669_v0  ;;  %466 = vmatpush3.bf16.msra.mxu1 %v517_v6  ;;  %v97_v22 = vrot.slane %v88_v21, %v96_v20  ;;  %v531_v36 = vld [vmem:[#allocation8] sm:$0xff]   ;;  %v175_v38 = vrot.slane %v88_v21, %v174_v37  ;;  %v291_v52 = vrot.slane %v88_v21, %v290_v50 }
  0x45   :  { %467 = vmatprep.subr.bf16.mxu1 %v669_v0  ;;  %484 = vmatpush3.bf16.msra.mxu0 %v524_v13  ;;  %p640_p1 = pnand %p639_p0, %p633_p11 }
  0x46   :  { %485 = vmatprep.subr.bf16.mxu0 %v669_v0 }
  0x48   :  { %468 = vmatpush3.bf16.msra.mxu1 %v518_v7 }
  0x49   :  { %469 = vmatprep.subr.bf16.mxu1 %v669_v0  ;;  %486 = vmatpush3.bf16.msra.mxu0 %v525_v14 }
  0x4a   :  { %487 = vmatprep.subr.bf16.mxu0 %v669_v0 }
  0x4c   :  { %470 = vmatpush3.bf16.msra.mxu1 %v519_v8 }
  0x4d   :  { %471 = vmatprep.subr.bf16.mxu1 %v669_v0  ;;  %488 = vmatpush3.bf16.msra.mxu0 %v526_v15 }
  0x4e   :  { %489 = vmatprep.subr.bf16.mxu0 %v669_v0 }
  0x50   :  { %472 = vmatpush3.bf16.msra.mxu1 %v520_v9 }
  0x51   :  { %473 = vmatprep.subr.bf16.mxu1 %v669_v0  ;;  %490 = vmatpush3.bf16.msra.mxu0 %v527_v16 }
  0x52   :  { %491 = vmatprep.subr.bf16.mxu0 %v669_v0 }
  0x54   :  { %474 = vmatpush3.bf16.msra.mxu1 %v521_v10 }
  0x55   :  { %475 = vmatprep.subr.bf16.mxu1 %v669_v0  ;;  %492 = vmatpush3.bf16.msra.mxu0 %v528_v17 }
  0x56   :  { %493 = vmatprep.subr.bf16.mxu0 %v669_v0 }
  0x58   :  { %476 = vmatpush3.bf16.msra.mxu1 %v522_v11 }
  0x59   :  { %477 = vmatprep.subr.bf16.mxu1 %v669_v0  ;;  %494 = vmatpush3.bf16.msra.mxu0 %v529_v34 }
  0x5a   :  { %495 = vmatprep.subr.bf16.mxu0 %v669_v0 }
  0x5c   :  { %478 = vmatpush3.bf16.msra.mxu1 %v523_v12 }
  0x5d   :  { %496 = vmatpush3.bf16.msra.mxu0 %v530_v35 }
  0x5e   :  { %497 = vmatprep.subr.bf16.mxu0 %v669_v0 }
  0x61   :  { %498 = vmatpush3.bf16.msra.mxu0 %v531_v36 }
 0x103   :  { %v142_v23 = vpop.f32.mrf.mxu0 }
 0x104   :  { %v143_v24 = vadd.f32 %v142_v23, %v97_v22 }
 0x105   :  { %v461_v25 = vpop.f32.mrf.mxu0 }
 0x106   :  { %v151_v27 = vmul.f32 0.01, %v143_v24  ;;  %vm149_vm2 = vcmp.ge.f32.partialorder %v143_v24, 0.0 }
 0x107   :  { %v145_v26 = vpop.f32.mrf.mxu0 }
 0x108   :  { %v146_v28 = vadd.f32 %v145_v26, %v97_v22  ;;  %v153_v31 = vsel %vm149_vm2, %v143_v24, %v151_v27 }
 0x109   :  { %v462_v29 = vpop.f32.mrf.mxu0 }
 0x10a   :  { %vm150_vm3 = vcmp.ge.f32.partialorder %v146_v28, 0.0  ;;  %v152_v30 = vmul.f32 0.01, %v146_v28 }
 0x10c   :  { %v154_v32 = vsel %vm150_vm3, %v146_v28, %v152_v30 }
 0x10d   :  { %v155_v33 = vpack.c.bf16 %v154_v32, %v153_v31 }
 0x10f   :  { %480 = vmatmul.mubr.bf16.vlgmr.msra.gmra.mxu1 %v155_v33 }
 0x1cf   :  { %v258_v39 = vpop.f32.mrf.mxu1 }
 0x1d0   :  { %v259_v40 = vadd.f32 %v258_v39, %v175_v38 }
 0x1d1   :  { %v481_v41 = vpop.f32.mrf.mxu1 }
 0x1d2   :  { %v267_v43 = vmul.f32 0.01, %v259_v40  ;;  %vm265_vm4 = vcmp.ge.f32.partialorder %v259_v40, 0.0 }
 0x1d3   :  { %v261_v42 = vpop.f32.mrf.mxu1 }
 0x1d4   :  { %v262_v44 = vadd.f32 %v261_v42, %v175_v38  ;;  %v269_v47 = vsel %vm265_vm4, %v259_v40, %v267_v43 }
 0x1d5   :  { %v482_v45 = vpop.f32.mrf.mxu1 }
 0x1d6   :  { %vm266_vm5 = vcmp.ge.f32.partialorder %v262_v44, 0.0  ;;  %v268_v46 = vmul.f32 0.01, %v262_v44 }
 0x1d8   :  { %v270_v48 = vsel %vm266_vm5, %v262_v44, %v268_v46 }
 0x1d9   :  { %v271_v49 = vpack.c.bf16 %v270_v48, %v269_v47 }
 0x1db   :  { %500 = vmatmul.mubr.bf16.vlgmr.msra.gmra.mxu0 %v271_v49 }
 0x29b   :  { %v374_v51 = vpop.f32.mrf.mxu0 }
 0x29c   :  { %v375_v55 = vadd.f32 %v374_v51, %v291_v52 }
 0x29d   :  { %v501_v53 = vpop.f32.mrf.mxu0 }
 0x29f   :  { %v377_v54 = vpop.f32.mrf.mxu0 }
 0x2a0   :  { %v378_v56 = vadd.f32 %v377_v54, %v291_v52 }
 0x2a1   :  { %v502_v57 = vpop.f32.mrf.mxu0 }
 0x2a2   :  { %v435_v58 = vpack.c.bf16 %v378_v56, %v375_v55 }
 0x2a4   :  { %436 = vst [vmem:[#allocation11] sm:$0xff] %v435_v58  }
 0x2a5   :  { %643 = shalt.err (!%p640_p1)
}
 0x2a6   :  { %402 = dma.vmem_to_hbm [thread:$0]  %s397_s4, 128, %s760_s5, [#allocation4], %s661_s21, %s661_s21, %s662_s22  }
 0x2a7   :  { %658 = dma.done.wait [#allocation4], 128  }
 0x2a8   :  { %659 = vsyncadd [#allocation4], 4294967168 }
 0x2a9   :  { %406 = vsyncpa [#allocation3], 1 }
 0x2aa   :  { %407 = vsyncpa [#allocation6], 1 }
 0x2ab   :  { %408 = vsyncpa [#allocation9], 1 }
 0x2ac   :  { %409 = vsyncpa [#allocation4], 1 }

</bundles_post_ra>
